<compile_context>
chip_gen: v6e
topology: v6e:2x2x1
jax: 0.10.0
libtpu: 0.0.40
codegen_flags: <defaults>
</compile_context>

<pallas_src>
import jax
import jax.numpy as jnp
from jax.experimental import pallas as pl
from jax.experimental.pallas import tpu as pltpu


_LANE = 128
_SUBLANE = 8
# Max elems per D-chunk (multiple of 128).  8 rows x 64K x 4B = 2 MiB per
# input per buffer -> 2 inputs x 2 buffers = 8 MiB, fits every generation's
# default scoped VMEM (v5e 16 MiB, v6e 32 MiB, v7x 32 MiB).
_TD_MAX = 64 * 1024


def _dice_partial_kernel(x_ref, t_ref, inter_ref, denom_ref):
    d = pl.program_id(1)

    x = x_ref[...].astype(jnp.float32)   # (TN, TD)
    t = t_ref[...].astype(jnp.float32)   # (TN, TD)

    # Per-sample partial reductions for this D-chunk.  The two denominator
    # sums are fused into a single pass: sum(x) + sum(t) == sum(x + t).
    inter = jnp.sum(x * t, axis=1, keepdims=True)   # (TN, 1)
    denom = jnp.sum(x + t, axis=1, keepdims=True)   # (TN, 1)

    # Accumulate across D-chunks; the output block stays resident in VMEM
    # across the inner ("arbitrary") grid axis.
    @pl.when(d == 0)
    def _():
        inter_ref[...] = inter
        denom_ref[...] = denom

    @pl.when(d != 0)
    def _():
        inter_ref[...] = inter_ref[...] + inter
        denom_ref[...] = denom_ref[...] + denom


def _round_up(a, b):
    return ((a + b - 1) // b) * b


@jax.jit
def dice_loss(inputs, target):
    """Pallas implementation of DiceLoss.forward(input, target)."""
    N = target.shape[0]
    # flatten like tensor.view(N, -1); keep native dtype (cast in-kernel)
    x = inputs.reshape(N, -1)
    t = target.reshape(N, -1)
    D = x.shape[1]

    # ---- tiling ----
    TN = _SUBLANE
    D_pad = _round_up(D, _LANE)
    if D_pad > _TD_MAX:
        TD = _TD_MAX
        D_pad = _round_up(D_pad, TD)
    else:
        TD = D_pad
    N_pad = _round_up(N, TN)

    # Pad only when needed; zeros are neutral for all three reductions and
    # padded rows are discarded below.
    if (N_pad != N) or (D_pad != D):
        pad = ((0, N_pad - N), (0, D_pad - D))
        x = jnp.pad(x, pad)
        t = jnp.pad(t, pad)

    grid = (N_pad // TN, D_pad // TD)

    inter, denom = pl.pallas_call(
        _dice_partial_kernel,
        out_shape=(
            jax.ShapeDtypeStruct((N_pad, 1), jnp.float32),
            jax.ShapeDtypeStruct((N_pad, 1), jnp.float32),
        ),
        grid_spec=pltpu.PrefetchScalarGridSpec(
            num_scalar_prefetch=0,
            grid=grid,
            in_specs=[
                pl.BlockSpec((TN, TD), lambda i, d: (i, d)),
                pl.BlockSpec((TN, TD), lambda i, d: (i, d)),
            ],
            out_specs=[
                pl.BlockSpec((TN, 1), lambda i, d: (i, 0)),
                pl.BlockSpec((TN, 1), lambda i, d: (i, 0)),
            ],
        ),
        compiler_params=pltpu.CompilerParams(
            dimension_semantics=("parallel", "arbitrary"),
            vmem_limit_bytes=32 * 1024 * 1024,
        ),
    )(x, t)

    # Tiny per-sample epilogue in the wrapper (N scalars).
    smooth = jnp.float32(1.0)
    inter_n = inter[:N, 0]
    denom_n = denom[:N, 0]
    dice = 2.0 * (inter_n + smooth) / (denom_n + smooth)
    return jnp.float32(1.0) - jnp.sum(dice) / jnp.float32(N)


def _dice_loss_ref(inputs, target):
    """Pure-JAX reference matching the PyTorch module exactly."""
    N = target.shape[0]
    smooth = 1.0
    x = inputs.reshape(N, -1).astype(jnp.float32)
    t = target.reshape(N, -1).astype(jnp.float32)
    inter = (x * t).sum(axis=1)
    loss = 2.0 * (inter + smooth) / (x.sum(axis=1) + t.sum(axis=1) + smooth)
    return 1.0 - loss.sum() / N


if __name__ == "__main__":
    key = jax.random.PRNGKey(0)
    k1, k2 = jax.random.split(key)

    # NCHW, small shapes: batch=2, channels=4, spatial=16x16
    N, C, H, W = 2, 4, 16, 16
    pred = jax.nn.sigmoid(jax.random.normal(k1, (N, C, H, W), dtype=jnp.float32))
    tgt = (jax.random.uniform(k2, (N, C, H, W)) > 0.5).astype(jnp.float32)

    loss = dice_loss(pred, tgt)
    loss = jax.block_until_ready(loss)

    ref = _dice_loss_ref(pred, tgt)
    assert jnp.allclose(loss, ref, rtol=1e-5, atol=1e-5), (loss, ref)

    print("KERNEL_OK")
</pallas_src>

<mosaic_0001>
module attributes {stable_mosaic.version = 11 : i64} {
  func.func @_dice_partial_kernel(%arg0: i32, %arg1: i32, %arg2: memref<8x1024xf32, #tpu.memory_space<vmem>>, %arg3: memref<8x1024xf32, #tpu.memory_space<vmem>>, %arg4: memref<8x1xf32, #tpu.memory_space<vmem>>, %arg5: memref<8x1xf32, #tpu.memory_space<vmem>>) attributes {dimension_semantics = [#tpu.dimension_semantics<parallel>, #tpu.dimension_semantics<arbitrary>], iteration_bounds = array<i64: 1, 1>, scalar_prefetch = 0 : i64, scratch_operands = 0 : i64, tpu.core_type = #tpu.core_type<tc>, window_params = [{transform_indices = @transform_0, window_bounds = array<i64: 8, 1024>}, {transform_indices = @transform_1, window_bounds = array<i64: 8, 1024>}, {transform_indices = @transform_2, window_bounds = array<i64: 8, 1>}, {transform_indices = @transform_3, window_bounds = array<i64: 8, 1>}]} {
    %c0 = arith.constant 0 : index
    %c0_0 = arith.constant 0 : index
    %0 = vector.load %arg2[%c0, %c0_0] : memref<8x1024xf32, #tpu.memory_space<vmem>>, vector<8x1024xf32>
    %c0_1 = arith.constant 0 : index
    %c0_2 = arith.constant 0 : index
    %1 = vector.load %arg3[%c0_1, %c0_2] : memref<8x1024xf32, #tpu.memory_space<vmem>>, vector<8x1024xf32>
    %2 = arith.mulf %0, %1 : vector<8x1024xf32>
    %cst = arith.constant dense<0.000000e+00> : vector<8xf32>
    %3 = vector.multi_reduction <add>, %2, %cst [1] : vector<8x1024xf32> to vector<8xf32>
    %4 = vector.shape_cast %3 : vector<8xf32> to vector<8x1xf32>
    %5 = arith.addf %0, %1 : vector<8x1024xf32>
    %cst_3 = arith.constant dense<0.000000e+00> : vector<8xf32>
    %6 = vector.multi_reduction <add>, %5, %cst_3 [1] : vector<8x1024xf32> to vector<8xf32>
    %7 = vector.shape_cast %6 : vector<8xf32> to vector<8x1xf32>
    %c0_i32 = arith.constant 0 : i32
    %8 = arith.cmpi eq, %arg1, %c0_i32 : i32
    %9 = arith.extui %8 : i1 to i32
    %c0_i32_4 = arith.constant 0 : i32
    %10 = arith.cmpi ne, %9, %c0_i32_4 : i32
    scf.if %10 {
      %c0_7 = arith.constant 0 : index
      %c0_8 = arith.constant 0 : index
      %14 = vector.load %arg4[%c0_7, %c0_8] : memref<8x1xf32, #tpu.memory_space<vmem>>, vector<8x1xf32>
      tpu.vector_store %arg4[%c0_7, %c0_8], %4 {strides = array<i32>} : memref<8x1xf32, #tpu.memory_space<vmem>>, vector<8x1xf32>,
      %c0_9 = arith.constant 0 : index
      %c0_10 = arith.constant 0 : index
      %15 = vector.load %arg5[%c0_9, %c0_10] : memref<8x1xf32, #tpu.memory_space<vmem>>, vector<8x1xf32>
      tpu.vector_store %arg5[%c0_9, %c0_10], %7 {strides = array<i32>} : memref<8x1xf32, #tpu.memory_space<vmem>>, vector<8x1xf32>,
    } else {
    }
    %c0_i32_5 = arith.constant 0 : i32
    %11 = arith.cmpi ne, %arg1, %c0_i32_5 : i32
    %12 = arith.extui %11 : i1 to i32
    %c0_i32_6 = arith.constant 0 : i32
    %13 = arith.cmpi ne, %12, %c0_i32_6 : i32
    scf.if %13 {
      %c0_7 = arith.constant 0 : index
      %c0_8 = arith.constant 0 : index
      %14 = vector.load %arg4[%c0_7, %c0_8] : memref<8x1xf32, #tpu.memory_space<vmem>>, vector<8x1xf32>
      %15 = arith.addf %14, %4 : vector<8x1xf32>
      %c0_9 = arith.constant 0 : index
      %c0_10 = arith.constant 0 : index
      %16 = vector.load %arg4[%c0_9, %c0_10] : memref<8x1xf32, #tpu.memory_space<vmem>>, vector<8x1xf32>
      tpu.vector_store %arg4[%c0_9, %c0_10], %15 {strides = array<i32>} : memref<8x1xf32, #tpu.memory_space<vmem>>, vector<8x1xf32>,
      %c0_11 = arith.constant 0 : index
      %c0_12 = arith.constant 0 : index
      %17 = vector.load %arg5[%c0_11, %c0_12] : memref<8x1xf32, #tpu.memory_space<vmem>>, vector<8x1xf32>
      %18 = arith.addf %17, %7 : vector<8x1xf32>
      %c0_13 = arith.constant 0 : index
      %c0_14 = arith.constant 0 : index
      %19 = vector.load %arg5[%c0_13, %c0_14] : memref<8x1xf32, #tpu.memory_space<vmem>>, vector<8x1xf32>
      tpu.vector_store %arg5[%c0_13, %c0_14], %18 {strides = array<i32>} : memref<8x1xf32, #tpu.memory_space<vmem>>, vector<8x1xf32>,
    } else {
    }
    return
  }
  func.func @transform_0(%arg0: i32, %arg1: i32) -> (i32, i32) {
    %c0_i32 = arith.constant 0 : i32
    return %arg0, %arg1 : i32, i32
  }
  func.func @transform_1(%arg0: i32, %arg1: i32) -> (i32, i32) {
    %c0_i32 = arith.constant 0 : i32
    return %arg0, %arg1 : i32, i32
  }
  func.func @transform_2(%arg0: i32, %arg1: i32) -> (i32, i32) {
    %c0_i32 = arith.constant 0 : i32
    %c0_i32_0 = arith.constant 0 : i32
    return %arg0, %c0_i32 : i32, i32
  }
  func.func @transform_3(%arg0: i32, %arg1: i32) -> (i32, i32) {
    %c0_i32 = arith.constant 0 : i32
    %c0_i32_0 = arith.constant 0 : i32
    return %arg0, %c0_i32 : i32, i32
  }
}

</mosaic_0001>

<bundles_post_ra>
// kernel: dice_loss.1
= control target key start
LH: loop header
LB: loop body
LE: loop exit
PB: predicated region body
PF: predicated region fallthrough
CT: control target
= control target key end

     0   :  { %vm67_vm0 = vcmask 7168   ;;  %s163_s0 = inlined_call_operand.vmem [shape: f32[8,1024], index: 0, kind: input, shape index: {}]   ;;  %s164_s1 = inlined_call_operand.vmem [shape: f32[8,1024], index: 1, kind: input, shape index: {}]   ;;  %s165_s2 = inlined_call_operand.vmem [shape: f32[8,1], index: 2, kind: output, shape index: {0}]   ;;  %s166_s3 = inlined_call_operand.vmem [shape: f32[8,1], index: 3, kind: output, shape index: {1}]  }
   0x1   :  { %v13_v0 = vld [vmem:[%s163_s0] sm:$0xff]  ;;  %v14_v1 = vld [vmem:[%s163_s0 + $0x8] sm:$0xff]  ;;  %v15_v2 = vld [vmem:[%s163_s0 + $0x10] sm:$0xff] }
   0x2   :  { %v16_v3 = vld [vmem:[%s163_s0 + $0x18] sm:$0xff]  ;;  %v21_v4 = vld [vmem:[%s164_s1] sm:$0xff]  ;;  %v22_v5 = vld [vmem:[%s164_s1 + $0x8] sm:$0xff] }
   0x3   :  { %v23_v6 = vld [vmem:[%s164_s1 + $0x10] sm:$0xff]  ;;  %v24_v7 = vld [vmem:[%s164_s1 + $0x18] sm:$0xff]  ;;  %v29_v8 = vmul.f32 %v21_v4, %v13_v0  ;;  %v46_v9 = vadd.f32 %v21_v4, %v13_v0  ;;  %v30_v10 = vmul.f32 %v22_v5, %v14_v1  ;;  %v47_v12 = vadd.f32 %v22_v5, %v14_v1  ;;  %v17_v13 = vld [vmem:[%s163_s0 + $0x20] sm:$0xff] }
   0x4   :  { %v31_v11 = vmul.f32 %v23_v6, %v15_v2  ;;  %v25_v14 = vld [vmem:[%s164_s1 + $0x20] sm:$0xff]  ;;  %v48_v15 = vadd.f32 %v23_v6, %v15_v2  ;;  %v32_v16 = vmul.f32 %v24_v7, %v16_v3  ;;  %v18_v18 = vld [vmem:[%s163_s0 + $0x28] sm:$0xff]  ;;  %v49_v20 = vadd.f32 %v24_v7, %v16_v3  ;;  %v19_v24 = vld [vmem:[%s163_s0 + $0x30] sm:$0xff] }
   0x5   :  { %v37_v17 = vadd.f32 %v30_v10, %v29_v8  ;;  %v26_v19 = vld [vmem:[%s164_s1 + $0x28] sm:$0xff]  ;;  %v54_v21 = vadd.f32 %v47_v12, %v46_v9  ;;  %v33_v22 = vmul.f32 %v25_v14, %v17_v13  ;;  %v27_v25 = vld [vmem:[%s164_s1 + $0x30] sm:$0xff]  ;;  %v50_v26 = vadd.f32 %v25_v14, %v17_v13  ;;  %v20_v30 = vld [vmem:[%s163_s0 + $0x38] sm:$0xff] }
   0x6   :  { %v34_v28 = vmul.f32 %v26_v19, %v18_v18  ;;  %v28_v31 = vld [vmem:[%s164_s1 + $0x38] sm:$0xff]  ;;  %v51_v32 = vadd.f32 %v26_v19, %v18_v18  ;;  %v35_v34 = vmul.f32 %v27_v25, %v19_v24  ;;  %v52_v36 = vadd.f32 %v27_v25, %v19_v24 }
   0x7   :  { %v38_v23 = vadd.f32 %v37_v17, %v31_v11  ;;  %v55_v27 = vadd.f32 %v54_v21, %v48_v15  ;;  %v36_v38 = vmul.f32 %v28_v31, %v20_v30  ;;  %v53_v42 = vadd.f32 %v28_v31, %v20_v30 }
   0x9   :  { %v39_v29 = vadd.f32 %v38_v23, %v32_v16  ;;  %v56_v33 = vadd.f32 %v55_v27, %v49_v20 }
   0xb   :  { %v40_v35 = vadd.f32 %v39_v29, %v33_v22  ;;  %v57_v37 = vadd.f32 %v56_v33, %v50_v26 }
   0xd   :  { %v41_v39 = vadd.f32 %v40_v35, %v34_v28  ;;  %v58_v40 = vadd.f32 %v57_v37, %v51_v32 }
   0xf   :  { %v42_v41 = vadd.f32 %v41_v39, %v35_v34  ;;  %v59_v43 = vadd.f32 %v58_v40, %v52_v36 }
  0x11   :  { %v43_v44 = vadd.f32 %v42_v41, %v36_v38  ;;  %v60_v45 = vadd.f32 %v59_v43, %v53_v42 }
  0x13   :  { %44 = vadd.xlane.f32.xlu0 %v43_v44 }
  0x17   :  { %61 = vadd.xlane.f32.xlu0 %v60_v45 }
  0x9c   :  { %v45_v46 = vpop.xlane.xlu0 %44 }
  0x9d   :  { %68 = vst.msk [vmem:[%s165_s2] sm:$0xff] %vm67_vm0, %v45_v46 }
  0xa0   :  { %v62_v47 = vpop.xlane.xlu0 %61 }
  0xa1   :  { %69 = vst.msk [vmem:[%s166_s3] sm:$0xff] %vm67_vm0, %v62_v47 }

</bundles_post_ra>
